<compile_context>
chip_gen: v7x
topology: tpu7x:2x2x1
jax: 0.10.0
libtpu: 0.0.40
codegen_flags: <defaults>
</compile_context>

<pallas_src>
import jax
import jax.numpy as jnp
import numpy as np
from jax.experimental import pallas as pl
from jax.experimental.pallas import tpu as pltpu


def transition_kernel(x_ref, scale_ref, shift_ref, w_ref, o_ref):
    # x_ref:     (2, 2, TILE_S, Cin_p)  four 2x2-pooling taps of this tile
    # scale_ref: (1, Cin_p)             0.25 * gamma / sqrt(var + eps)
    # shift_ref: (1, Cin_p)             0.25 * (beta - mean * gamma / sqrt(var+eps))
    # w_ref:     (Cin_p, Cout_p)        1x1 conv weight (transposed, zero-padded)
    # o_ref:     (TILE_S, Cout_p)
    scale = scale_ref[...]
    shift = shift_ref[...]

    def bn_relu(tap):                         # VPU only, f32 math
        return jnp.maximum(tap.astype(jnp.float32) * scale + shift, 0.0)

    # 2x2 average pool of relu(bn(x)); the 1/4 is already folded into scale/shift.
    pooled = (bn_relu(x_ref[0, 0]) + bn_relu(x_ref[0, 1]) +
              bn_relu(x_ref[1, 0]) + bn_relu(x_ref[1, 1]))

    # 1x1 conv on the pooled tile (pool and 1x1 conv commute: both linear,
    # both after the ReLU).  Only the MXU inputs are cast (bf16 by default).
    o_ref[...] = jnp.dot(pooled.astype(w_ref.dtype), w_ref[...],
                         preferred_element_type=jnp.float32).astype(o_ref.dtype)


def _tpu_vmem_capacity_bytes():
    """Per-core VMEM capacity; conservative (v7x-sized) if detection fails."""
    try:
        info = pltpu.get_tpu_info()
        cap = getattr(info, "vmem_capacity_bytes", None)
        if cap:
            return int(cap)
    except Exception:
        pass
    try:
        kind = jax.devices()[0].device_kind.lower()
    except Exception:
        kind = ""
    if "v5" in kind or "v6" in kind:
        return 128 * 2 ** 20
    return 64 * 2 ** 20


def _pick_spatial_tile(S, target, multiple=16):
    """Return (tile, padded_S). tile is a multiple of `multiple` and <= max(target, multiple)."""
    target = max(multiple, (target // multiple) * multiple)
    # Prefer an exact divisor of S (no padding needed).
    for t in range(min(target, S), multiple - 1, -1):
        if S % t == 0 and t % multiple == 0:
            return t, S
    # Otherwise pad S up to a multiple of a clean tile size (pad sliced off later).
    tile = min(target, ((S + multiple - 1) // multiple) * multiple)
    s_pad = ((S + tile - 1) // tile) * tile
    return tile, s_pad


def transition_forward(x_nchw, gamma, beta, running_mean, running_var, conv_w,
                       eps=1e-5, spatial_tile=None,
                       matmul_dtype=jnp.bfloat16,
                       intermediate_dtype=jnp.bfloat16,
                       channels_last_out=False):
    N, Cin, H, W = x_nchw.shape
    Cout = conv_w.shape[0]
    assert H % 2 == 0 and W % 2 == 0  # TODO(synk): odd H/W (PyTorch floor) not handled
    Ho, Wo = H // 2, W // 2
    S = Ho * Wo

    itemsize_in = jnp.dtype(intermediate_dtype).itemsize
    itemsize_w = jnp.dtype(matmul_dtype).itemsize

    # ---- channel padding ----
    # Lane-dense output: Cout padded to a multiple of 128 (unmasked vst).
    Cout_p = ((Cout + 127) // 128) * 128
    # Lane-dense input: pad Cin to a multiple of 128 only when the relative HBM
    # overhead is small; padded weight rows are zero so the result is exact.
    cin_pad_to = ((Cin + 127) // 128) * 128
    Cin_p = cin_pad_to if (cin_pad_to != Cin and cin_pad_to <= int(1.25 * Cin)) else Cin
    if Cin % 128 == 0:
        Cin_p = Cin

    # ---- generation-aware VMEM budget & spatial tile ----
    vmem_cap = _tpu_vmem_capacity_bytes()
    cap = int(0.75 * vmem_cap)                       # ≈48 MiB v7x, ≈96 MiB v5e/v6e
    headroom = 2 * 2 ** 20
    # Constant operands (scale, shift, weight); counted double-buffered to stay
    # conservative in case the Buffered(1) request is rejected.
    const_bytes = 2 * (Cin_p * Cout_p * itemsize_w + 2 * Cin_p * 4)
    bytes_per_row = 2 * (4 * Cin_p * itemsize_in) + 2 * (Cout_p * 4)  # dbl-buffered in/out
    gen_target = 1024 if vmem_cap >= 100 * 2 ** 20 else 512
    budget = cap - const_bytes - headroom
    max_rows = max(16, (budget // bytes_per_row) // 16 * 16) if budget > 0 else 16

    if spatial_tile is None:
        spatial_tile, S_pad = _pick_spatial_tile(S, int(min(gen_target, max_rows)))
        # Give the v7x megacore two grid steps even at batch 1 when possible.
        if N == 1 and S_pad // spatial_tile < 2 and spatial_tile >= 32 \
                and (spatial_tile // 2) % 16 == 0:
            spatial_tile //= 2
            S_pad = ((S + spatial_tile - 1) // spatial_tile) * spatial_tile
    else:
        assert spatial_tile % 16 == 0, "spatial_tile must be a multiple of 16"
        S_pad = ((S + spatial_tile - 1) // spatial_tile) * spatial_tile
    n_s = S_pad // spatial_tile

    est = spatial_tile * bytes_per_row + const_bytes
    vmem_limit = int(min(cap, max(8 * 2 ** 20, est + headroom)))

    # ---- plain-JAX glue: fold BN (inference) and the 1/4 pool into scale/shift ----
    # relu(0.25*y) == 0.25*relu(y) (0.25 > 0, power of two => exact).
    inv_std = 1.0 / jnp.sqrt(running_var.astype(jnp.float32) + eps)
    scale_c = 0.25 * gamma.astype(jnp.float32) * inv_std
    shift_c = 0.25 * (beta.astype(jnp.float32)
                      - running_mean.astype(jnp.float32) * gamma.astype(jnp.float32) * inv_std)
    scale = jnp.pad(scale_c.reshape(1, Cin), ((0, 0), (0, Cin_p - Cin)))
    shift = jnp.pad(shift_c.reshape(1, Cin), ((0, 0), (0, Cin_p - Cin)))

    # Weight: (Cout, Cin, 1, 1) -> (Cin_p, Cout_p), padded rows/cols are exactly zero.
    w = conv_w.reshape(Cout, Cin).T.astype(jnp.float32)
    w_mat = jnp.zeros((Cin_p, Cout_p), jnp.float32).at[:Cin, :Cout].set(w)
    w_mat = w_mat.astype(matmul_dtype)

    # Single boundary transpose NCHW -> (N, 2, 2, Ho*Wo, Cin): the four 2x2
    # window taps become leading dims; stored in bf16 (default) to shrink the
    # HBM intermediate.
    x6 = x_nchw.reshape(N, Cin, Ho, 2, Wo, 2)
    x6 = jnp.transpose(x6, (0, 3, 5, 2, 4, 1))                 # (N, 2, 2, Ho, Wo, Cin)
    xk = x6.reshape(N, 2, 2, S, Cin).astype(intermediate_dtype)
    if S_pad != S or Cin_p != Cin:
        xk = jnp.pad(xk, ((0, 0), (0, 0), (0, 0), (0, S_pad - S), (0, Cin_p - Cin)))

    def _call(single_buffer_consts):
        const_kw = dict(pipeline_mode=pl.Buffered(1)) if single_buffer_consts else {}
        return pl.pallas_call(
            transition_kernel,
            out_shape=jax.ShapeDtypeStruct((N, S_pad, Cout_p), jnp.float32),
            grid=(N, n_s),
            in_specs=[
                pl.BlockSpec((pl.Squeezed(), 2, 2, spatial_tile, Cin_p),
                             lambda n, s: (n, 0, 0, s, 0)),
                pl.BlockSpec((1, Cin_p), lambda n, s: (0, 0), **const_kw),
                pl.BlockSpec((1, Cin_p), lambda n, s: (0, 0), **const_kw),
                pl.BlockSpec((Cin_p, Cout_p), lambda n, s: (0, 0), **const_kw),
            ],
            out_specs=pl.BlockSpec((pl.Squeezed(), spatial_tile, Cout_p),
                                   lambda n, s: (n, s, 0)),
            compiler_params=pltpu.CompilerParams(
                dimension_semantics=("parallel", "parallel"),
                vmem_limit_bytes=vmem_limit),
        )(xk, scale, shift, w_mat)

    try:
        # Constant index_map operands: single-buffer them (halves their VMEM).
        out = _call(True)
    except Exception:
        # This jax version rejects Buffered(1) / pipeline_mode -> default buffering.
        out = _call(False)

    # (N, S_pad, Cout_p) -> slice spatial / channel pad.
    out = out[:, :S, :Cout].reshape(N, Ho, Wo, Cout)
    if channels_last_out:
        return out                                  # NHWC (skips one HBM transpose pass)
    return jnp.transpose(out, (0, 3, 1, 2))          # NCHW (matches PyTorch)


def transition_reference(x, gamma, beta, mean, var, conv_w, eps=1e-5):
    # Pure-JAX reference mirroring PyTorch semantics (inference-mode BN).
    N, Cin, H, W = x.shape
    Cout = conv_w.shape[0]
    xn = (x - mean[None, :, None, None]) / jnp.sqrt(var + eps)[None, :, None, None]
    y = jnp.maximum(xn * gamma[None, :, None, None] + beta[None, :, None, None], 0.0)
    o = jnp.einsum("nchw,oc->nohw", y, conv_w.reshape(Cout, Cin))
    o = o.reshape(N, Cout, H // 2, 2, W // 2, 2).mean(axis=(3, 5))
    return o


if __name__ == "__main__":
    key = jax.random.PRNGKey(0)
    N, Cin, Cout, H, W = 2, 4, 8, 16, 16

    k0, k1, k2, k3, k4, k5 = jax.random.split(key, 6)
    x = jax.random.normal(k0, (N, Cin, H, W), dtype=jnp.float32)

    # Deterministic parameter init (shapes from Transition.__init__).
    gamma = 1.0 + 0.1 * jax.random.normal(k1, (Cin,), dtype=jnp.float32)       # bn.weight
    beta = 0.1 * jax.random.normal(k2, (Cin,), dtype=jnp.float32)              # bn.bias
    running_mean = 0.05 * jax.random.normal(k3, (Cin,), dtype=jnp.float32)
    running_var = jnp.abs(1.0 + 0.1 * jax.random.normal(k4, (Cin,), dtype=jnp.float32))
    conv_w = jax.random.normal(k5, (Cout, Cin, 1, 1), dtype=jnp.float32) * 0.2

    ref = transition_reference(x, gamma, beta, running_mean, running_var, conv_w)

    # Exact f32 path, explicit spatial tiling (grid = (2, 4)).
    out = transition_forward(x, gamma, beta, running_mean, running_var, conv_w,
                             spatial_tile=16,
                             matmul_dtype=jnp.float32,
                             intermediate_dtype=jnp.float32)
    out = jax.block_until_ready(out)
    np.testing.assert_allclose(np.asarray(out), np.asarray(ref), rtol=1e-5, atol=1e-5)
    assert out.shape == (N, Cout, H // 2, W // 2)

    # Default path: bf16 HBM intermediate + bf16 MXU inputs, auto tile, looser tol.
    out_bf16 = transition_forward(x, gamma, beta, running_mean, running_var, conv_w)
    out_bf16 = jax.block_until_ready(out_bf16)
    np.testing.assert_allclose(np.asarray(out_bf16), np.asarray(ref), rtol=5e-2, atol=5e-2)

    # Channels-last output epilogue (skips the NHWC->NCHW transpose).
    out_nhwc = transition_forward(x, gamma, beta, running_mean, running_var, conv_w,
                                  matmul_dtype=jnp.float32,
                                  intermediate_dtype=jnp.float32,
                                  channels_last_out=True)
    out_nhwc = jax.block_until_ready(out_nhwc)
    np.testing.assert_allclose(np.asarray(out_nhwc),
                               np.asarray(jnp.transpose(ref, (0, 2, 3, 1))),
                               rtol=1e-5, atol=1e-5)

    print("KERNEL_OK")
</pallas_src>

<mosaic_0001>
module attributes {stable_mosaic.version = 11 : i64} {
  func.func @transition_kernel(%arg0: i32, %arg1: i32, %arg2: memref<1x2x2x16x4xf32, #tpu.memory_space<vmem>>, %arg3: memref<1x4xf32, #tpu.memory_space<vmem>>, %arg4: memref<1x4xf32, #tpu.memory_space<vmem>>, %arg5: memref<4x128xf32, #tpu.memory_space<vmem>>, %arg6: memref<1x16x128xf32, #tpu.memory_space<vmem>>) attributes {dimension_semantics = [#tpu.dimension_semantics<parallel>, #tpu.dimension_semantics<parallel>], iteration_bounds = array<i64: 2, 4>, scalar_prefetch = 0 : i64, scratch_operands = 0 : i64, tpu.core_type = #tpu.core_type<tc>, window_params = [{transform_indices = @transform_0, window_bounds = array<i64: 1, 2, 2, 16, 4>}, {pipeline_mode = #tpu.pipeline_mode<synchronous>, transform_indices = @transform_1, window_bounds = array<i64: 1, 4>}, {pipeline_mode = #tpu.pipeline_mode<synchronous>, transform_indices = @transform_2, window_bounds = array<i64: 1, 4>}, {pipeline_mode = #tpu.pipeline_mode<synchronous>, transform_indices = @transform_3, window_bounds = array<i64: 4, 128>}, {transform_indices = @transform_4, window_bounds = array<i64: 1, 16, 128>}]} {
    %c0 = arith.constant 0 : index
    %c0_0 = arith.constant 0 : index
    %0 = vector.load %arg3[%c0, %c0_0] : memref<1x4xf32, #tpu.memory_space<vmem>>, vector<1x4xf32>
    %c0_1 = arith.constant 0 : index
    %c0_2 = arith.constant 0 : index
    %1 = vector.load %arg4[%c0_1, %c0_2] : memref<1x4xf32, #tpu.memory_space<vmem>>, vector<1x4xf32>
    %c0_3 = arith.constant 0 : index
    %c0_4 = arith.constant 0 : index
    %c0_5 = arith.constant 0 : index
    %c0_6 = arith.constant 0 : index
    %c0_7 = arith.constant 0 : index
    %2 = vector.load %arg2[%c0_3, %c0_4, %c0_5, %c0_6, %c0_7] : memref<1x2x2x16x4xf32, #tpu.memory_space<vmem>>, vector<1x1x1x16x4xf32>
    %3 = vector.shape_cast %2 : vector<1x1x1x16x4xf32> to vector<16x4xf32>
    %4 = vector.broadcast %0 : vector<1x4xf32> to vector<16x4xf32>
    %5 = arith.mulf %3, %4 : vector<16x4xf32>
    %6 = vector.broadcast %1 : vector<1x4xf32> to vector<16x4xf32>
    %7 = arith.addf %5, %6 : vector<16x4xf32>
    %cst = arith.constant 0.000000e+00 : f32
    %8 = vector.broadcast %cst : f32 to vector<16x4xf32>
    %9 = arith.maximumf %7, %8 : vector<16x4xf32>
    %c0_8 = arith.constant 0 : index
    %c0_9 = arith.constant 0 : index
    %c1 = arith.constant 1 : index
    %c0_10 = arith.constant 0 : index
    %c0_11 = arith.constant 0 : index
    %10 = vector.load %arg2[%c0_8, %c0_9, %c1, %c0_10, %c0_11] : memref<1x2x2x16x4xf32, #tpu.memory_space<vmem>>, vector<1x1x1x16x4xf32>
    %11 = vector.shape_cast %10 : vector<1x1x1x16x4xf32> to vector<16x4xf32>
    %12 = vector.broadcast %0 : vector<1x4xf32> to vector<16x4xf32>
    %13 = arith.mulf %11, %12 : vector<16x4xf32>
    %14 = vector.broadcast %1 : vector<1x4xf32> to vector<16x4xf32>
    %15 = arith.addf %13, %14 : vector<16x4xf32>
    %cst_12 = arith.constant 0.000000e+00 : f32
    %16 = vector.broadcast %cst_12 : f32 to vector<16x4xf32>
    %17 = arith.maximumf %15, %16 : vector<16x4xf32>
    %18 = arith.addf %9, %17 : vector<16x4xf32>
    %c0_13 = arith.constant 0 : index
    %c1_14 = arith.constant 1 : index
    %c0_15 = arith.constant 0 : index
    %c0_16 = arith.constant 0 : index
    %c0_17 = arith.constant 0 : index
    %19 = vector.load %arg2[%c0_13, %c1_14, %c0_15, %c0_16, %c0_17] : memref<1x2x2x16x4xf32, #tpu.memory_space<vmem>>, vector<1x1x1x16x4xf32>
    %20 = vector.shape_cast %19 : vector<1x1x1x16x4xf32> to vector<16x4xf32>
    %21 = vector.broadcast %0 : vector<1x4xf32> to vector<16x4xf32>
    %22 = arith.mulf %20, %21 : vector<16x4xf32>
    %23 = vector.broadcast %1 : vector<1x4xf32> to vector<16x4xf32>
    %24 = arith.addf %22, %23 : vector<16x4xf32>
    %cst_18 = arith.constant 0.000000e+00 : f32
    %25 = vector.broadcast %cst_18 : f32 to vector<16x4xf32>
    %26 = arith.maximumf %24, %25 : vector<16x4xf32>
    %27 = arith.addf %18, %26 : vector<16x4xf32>
    %c0_19 = arith.constant 0 : index
    %c1_20 = arith.constant 1 : index
    %c1_21 = arith.constant 1 : index
    %c0_22 = arith.constant 0 : index
    %c0_23 = arith.constant 0 : index
    %28 = vector.load %arg2[%c0_19, %c1_20, %c1_21, %c0_22, %c0_23] : memref<1x2x2x16x4xf32, #tpu.memory_space<vmem>>, vector<1x1x1x16x4xf32>
    %29 = vector.shape_cast %28 : vector<1x1x1x16x4xf32> to vector<16x4xf32>
    %30 = vector.broadcast %0 : vector<1x4xf32> to vector<16x4xf32>
    %31 = arith.mulf %29, %30 : vector<16x4xf32>
    %32 = vector.broadcast %1 : vector<1x4xf32> to vector<16x4xf32>
    %33 = arith.addf %31, %32 : vector<16x4xf32>
    %cst_24 = arith.constant 0.000000e+00 : f32
    %34 = vector.broadcast %cst_24 : f32 to vector<16x4xf32>
    %35 = arith.maximumf %33, %34 : vector<16x4xf32>
    %36 = arith.addf %27, %35 : vector<16x4xf32>
    %c0_25 = arith.constant 0 : index
    %c0_26 = arith.constant 0 : index
    %37 = vector.load %arg5[%c0_25, %c0_26] : memref<4x128xf32, #tpu.memory_space<vmem>>, vector<4x128xf32>
    %cst_27 = arith.constant dense<0.000000e+00> : vector<16x128xf32>
    %38 = tpu.matmul %36, %37, %cst_27 {dimension_numbers = #tpu.dot_dimension_numbers<[1], [0], [0], [1], [0, 0, 1, 1], [], []>} : vector<16x4xf32>, vector<4x128xf32>, vector<16x128xf32> -> vector<16x128xf32>
    %c0_28 = arith.constant 0 : index
    %c0_29 = arith.constant 0 : index
    %c0_30 = arith.constant 0 : index
    %39 = vector.load %arg6[%c0_28, %c0_29, %c0_30] : memref<1x16x128xf32, #tpu.memory_space<vmem>>, vector<1x16x128xf32>
    %40 = vector.shape_cast %39 : vector<1x16x128xf32> to vector<16x128xf32>
    %41 = vector.shape_cast %38 : vector<16x128xf32> to vector<1x16x128xf32>
    tpu.vector_store %arg6[%c0_28, %c0_29, %c0_30], %41 {strides = array<i32>} : memref<1x16x128xf32, #tpu.memory_space<vmem>>, vector<1x16x128xf32>,
    return
  }
  func.func @transform_0(%arg0: i32, %arg1: i32) -> (i32, i32, i32, i32, i32) {
    %c0_i32 = arith.constant 0 : i32
    %c0_i32_0 = arith.constant 0 : i32
    %c0_i32_1 = arith.constant 0 : i32
    %c0_i32_2 = arith.constant 0 : i32
    return %arg0, %c0_i32, %c0_i32_0, %arg1, %c0_i32_1 : i32, i32, i32, i32, i32
  }
  func.func @transform_1(%arg0: i32, %arg1: i32) -> (i32, i32) {
    %c0_i32 = arith.constant 0 : i32
    %c0_i32_0 = arith.constant 0 : i32
    %c0_i32_1 = arith.constant 0 : i32
    return %c0_i32, %c0_i32_0 : i32, i32
  }
  func.func @transform_2(%arg0: i32, %arg1: i32) -> (i32, i32) {
    %c0_i32 = arith.constant 0 : i32
    %c0_i32_0 = arith.constant 0 : i32
    %c0_i32_1 = arith.constant 0 : i32
    return %c0_i32, %c0_i32_0 : i32, i32
  }
  func.func @transform_3(%arg0: i32, %arg1: i32) -> (i32, i32) {
    %c0_i32 = arith.constant 0 : i32
    %c0_i32_0 = arith.constant 0 : i32
    %c0_i32_1 = arith.constant 0 : i32
    return %c0_i32, %c0_i32_0 : i32, i32
  }
  func.func @transform_4(%arg0: i32, %arg1: i32) -> (i32, i32, i32) {
    %c0_i32 = arith.constant 0 : i32
    %c0_i32_0 = arith.constant 0 : i32
    return %arg0, %arg1, %c0_i32 : i32, i32, i32
  }
}

module attributes {stable_mosaic.version = 11 : i64} {
  func.func @transition_kernel(%arg0: i32, %arg1: i32, %arg2: memref<1x2x2x16x4xf32, #tpu.memory_space<vmem>>, %arg3: memref<1x4xf32, #tpu.memory_space<vmem>>, %arg4: memref<1x4xf32, #tpu.memory_space<vmem>>, %arg5: memref<4x128xf32, #tpu.memory_space<vmem>>, %arg6: memref<1x16x128xf32, #tpu.memory_space<vmem>>) attributes {dimension_semantics = [#tpu.dimension_semantics<parallel>, #tpu.dimension_semantics<parallel>], iteration_bounds = array<i64: 2, 4>, scalar_prefetch = 0 : i64, scratch_operands = 0 : i64, tpu.core_type = #tpu.core_type<tc>, window_params = [{transform_indices = @transform_0, window_bounds = array<i64: 1, 2, 2, 16, 4>}, {pipeline_mode = #tpu.pipeline_mode<synchronous>, transform_indices = @transform_1, window_bounds = array<i64: 1, 4>}, {pipeline_mode = #tpu.pipeline_mode<synchronous>, transform_indices = @transform_2, window_bounds = array<i64: 1, 4>}, {pipeline_mode = #tpu.pipeline_mode<synchronous>, transform_indices = @transform_3, window_bounds = array<i64: 4, 128>}, {transform_indices = @transform_4, window_bounds = array<i64: 1, 16, 128>}]} {
    %c0 = arith.constant 0 : index
    %c0_0 = arith.constant 0 : index
    %0 = vector.load %arg3[%c0, %c0_0] : memref<1x4xf32, #tpu.memory_space<vmem>>, vector<1x4xf32>
    %c0_1 = arith.constant 0 : index
    %c0_2 = arith.constant 0 : index
    %1 = vector.load %arg4[%c0_1, %c0_2] : memref<1x4xf32, #tpu.memory_space<vmem>>, vector<1x4xf32>
    %c0_3 = arith.constant 0 : index
    %c0_4 = arith.constant 0 : index
    %c0_5 = arith.constant 0 : index
    %c0_6 = arith.constant 0 : index
    %c0_7 = arith.constant 0 : index
    %2 = vector.load %arg2[%c0_3, %c0_4, %c0_5, %c0_6, %c0_7] : memref<1x2x2x16x4xf32, #tpu.memory_space<vmem>>, vector<1x1x1x16x4xf32>
    %3 = vector.shape_cast %2 : vector<1x1x1x16x4xf32> to vector<16x4xf32>
    %4 = vector.broadcast %0 : vector<1x4xf32> to vector<16x4xf32>
    %5 = arith.mulf %3, %4 : vector<16x4xf32>
    %6 = vector.broadcast %1 : vector<1x4xf32> to vector<16x4xf32>
    %7 = arith.addf %5, %6 : vector<16x4xf32>
    %cst = arith.constant 0.000000e+00 : f32
    %8 = vector.broadcast %cst : f32 to vector<16x4xf32>
    %9 = arith.maximumf %7, %8 : vector<16x4xf32>
    %c0_8 = arith.constant 0 : index
    %c0_9 = arith.constant 0 : index
    %c1 = arith.constant 1 : index
    %c0_10 = arith.constant 0 : index
    %c0_11 = arith.constant 0 : index
    %10 = vector.load %arg2[%c0_8, %c0_9, %c1, %c0_10, %c0_11] : memref<1x2x2x16x4xf32, #tpu.memory_space<vmem>>, vector<1x1x1x16x4xf32>
    %11 = vector.shape_cast %10 : vector<1x1x1x16x4xf32> to vector<16x4xf32>
    %12 = vector.broadcast %0 : vector<1x4xf32> to vector<16x4xf32>
    %13 = arith.mulf %11, %12 : vector<16x4xf32>
    %14 = vector.broadcast %1 : vector<1x4xf32> to vector<16x4xf32>
    %15 = arith.addf %13, %14 : vector<16x4xf32>
    %cst_12 = arith.constant 0.000000e+00 : f32
    %16 = vector.broadcast %cst_12 : f32 to vector<16x4xf32>
    %17 = arith.maximumf %15, %16 : vector<16x4xf32>
    %18 = arith.addf %9, %17 : vector<16x4xf32>
    %c0_13 = arith.constant 0 : index
    %c1_14 = arith.constant 1 : index
    %c0_15 = arith.constant 0 : index
    %c0_16 = arith.constant 0 : index
    %c0_17 = arith.constant 0 : index
    %19 = vector.load %arg2[%c0_13, %c1_14, %c0_15, %c0_16, %c0_17] : memref<1x2x2x16x4xf32, #tpu.memory_space<vmem>>, vector<1x1x1x16x4xf32>
    %20 = vector.shape_cast %19 : vector<1x1x1x16x4xf32> to vector<16x4xf32>
    %21 = vector.broadcast %0 : vector<1x4xf32> to vector<16x4xf32>
    %22 = arith.mulf %20, %21 : vector<16x4xf32>
    %23 = vector.broadcast %1 : vector<1x4xf32> to vector<16x4xf32>
    %24 = arith.addf %22, %23 : vector<16x4xf32>
    %cst_18 = arith.constant 0.000000e+00 : f32
    %25 = vector.broadcast %cst_18 : f32 to vector<16x4xf32>
    %26 = arith.maximumf %24, %25 : vector<16x4xf32>
    %27 = arith.addf %18, %26 : vector<16x4xf32>
    %c0_19 = arith.constant 0 : index
    %c1_20 = arith.constant 1 : index
    %c1_21 = arith.constant 1 : index
    %c0_22 = arith.constant 0 : index
    %c0_23 = arith.constant 0 : index
    %28 = vector.load %arg2[%c0_19, %c1_20, %c1_21, %c0_22, %c0_23] : memref<1x2x2x16x4xf32, #tpu.memory_space<vmem>>, vector<1x1x1x16x4xf32>
    %29 = vector.shape_cast %28 : vector<1x1x1x16x4xf32> to vector<16x4xf32>
    %30 = vector.broadcast %0 : vector<1x4xf32> to vector<16x4xf32>
    %31 = arith.mulf %29, %30 : vector<16x4xf32>
    %32 = vector.broadcast %1 : vector<1x4xf32> to vector<16x4xf32>
    %33 = arith.addf %31, %32 : vector<16x4xf32>
    %cst_24 = arith.constant 0.000000e+00 : f32
    %34 = vector.broadcast %cst_24 : f32 to vector<16x4xf32>
    %35 = arith.maximumf %33, %34 : vector<16x4xf32>
    %36 = arith.addf %27, %35 : vector<16x4xf32>
    %c0_25 = arith.constant 0 : index
    %c0_26 = arith.constant 0 : index
    %37 = vector.load %arg5[%c0_25, %c0_26] : memref<4x128xf32, #tpu.memory_space<vmem>>, vector<4x128xf32>
    %cst_27 = arith.constant dense<0.000000e+00> : vector<16x128xf32>
    %38 = tpu.matmul %36, %37, %cst_27 {dimension_numbers = #tpu.dot_dimension_numbers<[1], [0], [0], [1], [0, 0, 1, 1], [], []>} : vector<16x4xf32>, vector<4x128xf32>, vector<16x128xf32> -> vector<16x128xf32>
    %c0_28 = arith.constant 0 : index
    %c0_29 = arith.constant 0 : index
    %c0_30 = arith.constant 0 : index
    %39 = vector.load %arg6[%c0_28, %c0_29, %c0_30] : memref<1x16x128xf32, #tpu.memory_space<vmem>>, vector<1x16x128xf32>
    %40 = vector.shape_cast %39 : vector<1x16x128xf32> to vector<16x128xf32>
    %41 = vector.shape_cast %38 : vector<16x128xf32> to vector<1x16x128xf32>
    tpu.vector_store %arg6[%c0_28, %c0_29, %c0_30], %41 {strides = array<i32>} : memref<1x16x128xf32, #tpu.memory_space<vmem>>, vector<1x16x128xf32>,
    return
  }
  func.func @transform_0(%arg0: i32, %arg1: i32) -> (i32, i32, i32, i32, i32) {
    %c0_i32 = arith.constant 0 : i32
    %c0_i32_0 = arith.constant 0 : i32
    %c0_i32_1 = arith.constant 0 : i32
    %c0_i32_2 = arith.constant 0 : i32
    return %arg0, %c0_i32, %c0_i32_0, %arg1, %c0_i32_1 : i32, i32, i32, i32, i32
  }
  func.func @transform_1(%arg0: i32, %arg1: i32) -> (i32, i32) {
    %c0_i32 = arith.constant 0 : i32
    %c0_i32_0 = arith.constant 0 : i32
    %c0_i32_1 = arith.constant 0 : i32
    return %c0_i32, %c0_i32_0 : i32, i32
  }
  func.func @transform_2(%arg0: i32, %arg1: i32) -> (i32, i32) {
    %c0_i32 = arith.constant 0 : i32
    %c0_i32_0 = arith.constant 0 : i32
    %c0_i32_1 = arith.constant 0 : i32
    return %c0_i32, %c0_i32_0 : i32, i32
  }
  func.func @transform_3(%arg0: i32, %arg1: i32) -> (i32, i32) {
    %c0_i32 = arith.constant 0 : i32
    %c0_i32_0 = arith.constant 0 : i32
    %c0_i32_1 = arith.constant 0 : i32
    return %c0_i32, %c0_i32_0 : i32, i32
  }
  func.func @transform_4(%arg0: i32, %arg1: i32) -> (i32, i32, i32) {
    %c0_i32 = arith.constant 0 : i32
    %c0_i32_0 = arith.constant 0 : i32
    return %arg0, %arg1, %c0_i32 : i32, i32, i32
  }
}

</mosaic_0001>

<bundles_post_ra>
// kernel: tpu_custom_call.1
= control target key start
LH: loop header
LB: loop body
LE: loop exit
PB: predicated region body
PF: predicated region fallthrough
CT: control target
= control target key end

     0   :  { %9 = vsyncpa [#allocation4], 0  ;;  %s917_s0 = inlined_call_operand.vmem [shape: f32[2,2,2,64,4], index: 0, kind: input, shape index: {}]   ;;  %s918_s1 = inlined_call_operand.vmem [shape: f32[1,4], index: 1, kind: input, shape index: {}]   ;;  %s919_s2 = inlined_call_operand.vmem [shape: f32[1,4], index: 2, kind: input, shape index: {}]   ;;  %s920_s3 = inlined_call_operand.vmem [shape: f32[4,128], index: 3, kind: input, shape index: {}]   ;;  %s921_s4 = inlined_call_operand.hbm [shape: f32[2,64,128], index: 4, kind: output, shape index: {}]  }
   0x1   :  { %11 = vsyncpa [#allocation4 + $0x1], 0  ;;  %s757_s15 = smov 0   ;;  %s759_s16 = smov 0  }
   0x2   :  { %s761_s17 = smov 0   ;;  %s763_s18 = smov 0  }
   0x3   :  { %s765_s19 = smov 0   ;;  %s767_s20 = smov 0  }
   0x4   :  { %s769_s21 = smov 0   ;;  %s771_s22 = smov 0  }
   0x5 LB: > { %s524_s23 = sadd.s32 4294967295, %s727_s22   ;;  %s525_s24 = sadd.s32 4294967294, %s727_s22   ;;  %s727_s22 = sphi %s771_s22, %s17_s22   ;;  %s723_s21 = sphi %s769_s21, %s931_s21   ;;  %s719_s20 = sphi %s767_s20, %s930_s20   ;;  %s715_s19 = sphi %s765_s19, %s929_s19   ;;  %s711_s18 = sphi %s763_s18, %s928_s18   ;;  %s707_s17 = sphi %s761_s17, %s927_s17   ;;  %s703_s16 = sphi %s759_s16, %s926_s16   ;;  %s699_s15 = sphi %s757_s15, %s925_s15  }
   0x6   : > { %s26_s25 = sadd.s32 1, %s719_s20  ;;  %s29_s26 = sadd.s32 1, %s723_s21 }
   0x7   : > { %p27_p0 = scmp.ge.s32.totalorder %s26_s25, 4  ;;  %p45_p1 = scmp.ne.s32.totalorder %s707_s17, %s703_s16 }
   0x8   : > { %p46_p2 = scmp.eq.s32.totalorder %s727_s22, 0  ;;  %p140_p5 = scmp.eq.s32.totalorder %s524_s23, 7 }
   0x9   : > { %s933_s25 = smov (%p27_p0, %s26_s25), 0  ;;  %s935_s26 = smov (!%p27_p0, %s29_s26), %s723_s21 }
   0xa   : > { %s34_s27 = ssub.s32 %s719_s20, %s933_s25  ;;  %p809_p3 = por %p46_p2, %p45_p1 }
   0xb   : > { %p31_p4 = scmp.ge.s32.totalorder %s935_s26, 2  ;;  %p145_p6 = scmp.ne.s32.totalorder %s703_s16, %s699_s15 }
   0xc   : > { %p146_p7 = scmp.eq.s32.totalorder %s525_s24, 7  ;;  %p817_p8 = por %p140_p5, %p45_p1 }
   0xd   : > { %s937_s26 = smov (%p31_p4, %s935_s26), 0  ;;  %s38_s7 = sadd.s32 1, %s707_s17 }
   0xe   : > { %p821_p9 = por %p146_p7, %p145_p6  ;;  %s33_s5 = ssub.s32 %s723_s21, %s937_s26 }
   0xf   : > { %s35_s6 = sor.u32 %s34_s27, %s33_s5  ;;  %p527_p11 = scmp.ge.s32.totalorder %s727_s22, 8 }
  0x10   : > { %p36_p10 = scmp.eq.s32.totalorder %s35_s6, 0 }
  0x11   : > { %171 = sbr.rel (%p527_p11) target bundleno = 35 (0x23), region = 28 }
  0x12   : > { %s829_s8 = scalar_select %p36_p10, %s707_s17, %s38_s7  }
  0x18   : > { %174 = sbr.rel (!%p809_p3) target bundleno = 35 (0x23), region = 32  ;;  %s176_s9 = sand.u32 (%p809_p3), 1, %s707_s17  }
  0x19   : > { %s529_s10 = sshll.u32 (%p809_p3), %s719_s20, 1  ;;  %s528_s11 = sshll.u32 (%p809_p3), %s176_s9, 6 }
  0x1a   : > { %s530_s12 = sshll.u32 (%p809_p3), %s723_s21, 5  ;;  %s178_s5 = scalar_lea.vmem (%p809_p3), [#allocation2], %s528_s11 }
  0x1b   : > { %s181_s13 = sadd.s32 (%p809_p3), %s530_s12, %s529_s10 }
  0x1c   : > { %s531_s14 = sshll.u32 (%p809_p3), %s181_s13, 3 }
  0x1d   : > { %s183_s27 = scalar_lea.vmem (%p809_p3), %s917_s0, %s531_s14 }
  0x1e   : > { %v225_v0 = vld [vmem:[%s183_s27] sm:$0xff] (%p809_p3)  ;;  %v227_v1 = vld [vmem:[%s183_s27 + $0x8] sm:$0xff] (%p809_p3) }
  0x1f   : > { %v229_v2 = vld [vmem:[%s183_s27 + $0x40] sm:$0xff]  ;;  %226 = vst [vmem:[%s178_s5] sm:$0xff] %v225_v0  ;;  %228 = vst [vmem:[%s178_s5 + $0x8] sm:$0xff] %v227_v1  ;;  %v231_v3 = vld [vmem:[%s183_s27 + $0x48] sm:$0xff] }
  0x20   : > { %230 = vst [vmem:[%s178_s5 + $0x10] sm:$0xff] %v229_v2  ;;  %v233_v4 = vld [vmem:[%s183_s27 + $0x80] sm:$0xff]  ;;  %v235_v5 = vld [vmem:[%s183_s27 + $0x88] sm:$0xff]  ;;  %232 = vst [vmem:[%s178_s5 + $0x18] sm:$0xff] %v231_v3 }
  0x21   : > { %234 = vst [vmem:[%s178_s5 + $0x20] sm:$0xff] %v233_v4  ;;  %236 = vst [vmem:[%s178_s5 + $0x28] sm:$0xff] %v235_v5  ;;  %v237_v6 = vld [vmem:[%s183_s27 + $0xc0] sm:$0xff]  ;;  %v239_v7 = vld [vmem:[%s183_s27 + $0xc8] sm:$0xff] }
  0x22   : > { %238 = vst [vmem:[%s178_s5 + $0x30] sm:$0xff] %v237_v6  ;;  %240 = vst [vmem:[%s178_s5 + $0x38] sm:$0xff] %v239_v7 }
  0x23 PF: > { %p532_p12 = scmp.ge.s32.totalorder %s727_s22, 1  ;;  %p245_p13 = scmp.lt.s32.totalorder %s727_s22, 9 }
  0x25   : > { %p246_p0 = pnand %p532_p12, %p245_p13 }
  0x26   : > { %v334_v8 = vld [vmem:[%s920_s3] sm:$0xf] (!%p246_p0)  ;;  %vm342_vm0 = vcmask (!%p246_p0), 1043456   ;;  %s846_s7 = sand.u32 (!%p246_p0), 1, %s703_s16   ;;  %vm335_vm1 = vcmask (!%p246_p0), 31744   ;;  %s547_s24 = sshll.u32 (!%p246_p0), %s711_s18, 1 }
  0x27   : > { %249 = sbr.rel (%p246_p0) target bundleno = 283 (0x11b), region = 70  ;;  %555 = vmatprep.subr.msk.mxu0 (!%p246_p0), %vm342_vm0, %v334_v8  ;;  %s533_s9 = sshll.u32 (!%p246_p0), %s846_s7, 6  ;;  %v535_v9 = vld [vmem:[%s918_s1] ss:$0 sm:$0xff] (!%p246_p0) }
  0x28   : > { %556 = vmatpush3.msk.msra.mxu0 (!%p246_p0), %vm342_vm0, %v334_v8  ;;  %v536_v10 = vld [vmem:[%s919_s2] ss:$0 sm:$0xff] (!%p246_p0)  ;;  %s254_s14 = scalar_lea.vmem (!%p246_p0), [#allocation2], %s533_s9  ;;  %s534_s23 = sshll.u32 (!%p246_p0), %s846_s7, 4 }
  0x29   : > { %v281_v11 = vld [vmem:[%s254_s14] sm:$0xff] (!%p246_p0)  ;;  %v537_v12 = vld [vmem:[%s254_s14 + $0x10] sm:$0xff] (!%p246_p0)  ;;  %v282_v18 = vld [vmem:[%s254_s14 + $0x8] sm:$0xff] (!%p246_p0)  ;;  %s548_s27 = sshll.u32 (!%p246_p0), %s715_s19, 3  ;;  %s276_s28 = scalar_lea.vmem (!%p246_p0), [#allocation3], %s534_s23 }
  0x2a   : > { %v539_v13 = vld [vmem:[%s254_s14 + $0x20] sm:$0xff] (!%p246_p0)  ;;  %v289_v14 = vmul.f32 (!%p246_p0), %v535_v9, %v281_v11  ;;  %v304_v15 = vmul.f32 (!%p246_p0), %v537_v12, %v535_v9  ;;  %v541_v17 = vld [vmem:[%s254_s14 + $0x30] sm:$0xff] (!%p246_p0)  ;;  %v538_v19 = vld [vmem:[%s254_s14 + $0x18] sm:$0xff] (!%p246_p0)  ;;  %v290_v21 = vmul.f32 (!%p246_p0), %v535_v9, %v282_v18  ;;  %s436_s5 = sadd.s32 (!%p246_p0), %s548_s27, %s547_s24  ;;  %s439_s6 = sshll.u32 (!%p246_p0), %s276_s28, 4  ;;  %s858_s6 = int_to_ptr.vmem [resolvable:$true] %s439_s6 }
  0x2b   : > { %v315_v16 = vmul.f32 (!%p246_p0), %v539_v13, %v535_v9  ;;  %v326_v20 = vmul.f32 (!%p246_p0), %v541_v17, %v535_v9  ;;  %v305_v22 = vmul.f32 (!%p246_p0), %v538_v19, %v535_v9  ;;  %v540_v23 = vld [vmem:[%s254_s14 + $0x28] sm:$0xff] (!%p246_p0)  ;;  %v542_v24 = vld [vmem:[%s254_s14 + $0x38] sm:$0xff] (!%p246_p0)  ;;  %s549_s9 = sshll.u32 (!%p246_p0), %s436_s5, 7  ;;  %s424_s18 = scalar_lea.sflag (!%p246_p0), [#allocation4], %s846_s7 }
  0x2c   : > { %v297_v25 = vadd.f32 (!%p246_p0), %v536_v10, %v289_v14  ;;  %v306_v26 = vadd.f32 (!%p246_p0), %v536_v10, %v304_v15  ;;  %v316_v28 = vmul.f32 (!%p246_p0), %v540_v23, %v535_v9  ;;  %v298_v30 = vadd.f32 (!%p246_p0), %v536_v10, %v290_v21  ;;  %s863_s12 = scalar_lea.hbm (!%p246_p0), %s921_s4, %s549_s9  ;;  %s633_s19 = scalar_lea.vmem (!%p246_p0), %s858_s6, 256 }
  0x2d   : > { %v317_v27 = vadd.f32 (!%p246_p0), %v536_v10, %v315_v16  ;;  %v328_v29 = vadd.f32 (!%p246_p0), %v536_v10, %v326_v20  ;;  %v307_v31 = vadd.f32 (!%p246_p0), %v536_v10, %v305_v22  ;;  %v327_v32 = vmul.f32 (!%p246_p0), %v542_v24, %v535_v9  ;;  %p634_p1 = scmp.ne.s32.totalorder (!%p246_p0), %s858_s6, %s633_s19  ;;  %s729_s13 = smov (!%p246_p0), [#allocation3]  }
  0x2e   : > { %v299_v33 = vmax.f32 %v297_v25, 0.0  ;;  %v308_v34 = vmax.f32 %v306_v26, 0.0  ;;  %v318_v36 = vadd.f32 %v536_v10, %v316_v28  ;;  %v300_v37 = vmax.f32 %v298_v30, 0.0  ;;  %s637_s14 = sshll.u32 %s729_s13, 4  ;;  %s638_s14 = int_to_ptr.vmem [resolvable:$false] %s637_s14 }
  0x2f   : > { %v319_v35 = vmax.f32 %v317_v27, 0.0  ;;  %v309_v38 = vmax.f32 %v307_v31, 0.0  ;;  %v329_v39 = vadd.f32 %v536_v10, %v327_v32  ;;  %v330_v41 = vmax.f32 %v328_v29, 0.0  ;;  %p635_p2 = pnand %p634_p1, %p817_p8  ;;  %s639_s23 = scalar_lea.vmem %s638_s14, 512 }
  0x30   : > { %v310_v40 = vadd.f32 %v308_v34, %v299_v33  ;;  %v320_v42 = vmax.f32 %v318_v36, 0.0  ;;  %p640_p4 = scmp.lt.s32.totalorder %s858_s6, %s638_s14  ;;  %p641_p5 = scmp.lt.s32.totalorder %s639_s23, %s633_s19 }
  0x31   : > { %v311_v43 = vadd.f32 %v309_v38, %v300_v37  ;;  %v331_v44 = vmax.f32 %v329_v39, 0.0  ;;  %p636_p3 = pneg %p635_p2 }
  0x32   : > { %v321_v45 = vadd.f32 %v319_v35, %v310_v40  ;;  %p642_p6 = por %p641_p5, %p640_p4 }
  0x33   : > { %v322_v46 = vadd.f32 %v320_v42, %v311_v43 }
  0x34   : > { %v332_v47 = vadd.f32 %v330_v41, %v321_v45  ;;  %p643_p7 = pnand %p642_p6, %p636_p3 }
  0x35   : > { %v333_v48 = vadd.f32 %v331_v44, %v322_v46 }
  0x36   : > { %557 = vmatprep.mubr.msk.f32.mxu0 %vm335_vm1, %v332_v47 }
  0x37   : > { %558 = vmatmul.mubr.msk.f32.vlgmr.msra.gmra.mrb[0].mxu0 %vm335_vm1, %v333_v48 }
 0x10a   : > { %v559_v49 = vpop.f32.mrb[0].mxu0 }
 0x10b   : > { %422 = vst [vmem:[%s276_s28 + $0x8] sm:$0xff] %v559_v49  ;;  %v412_v50 = vpop.f32.mrb[1].mxu0 }
 0x10c   : > { %421 = vst [vmem:[%s276_s28] sm:$0xff] %v412_v50 }
 0x10d   : > { %646 = shalt.err (!%p643_p7)
}
 0x10e   : > { %s647_s24 = scalar_lea.hbm %s863_s12, 256  ;;  %s651_s28 = scalar_lea.hbm %s921_s4, 2048 }
 0x10f   : > { %p648_p10 = scmp.ne.s32.totalorder %s863_s12, %s647_s24  ;;  %p652_p13 = scmp.lt.u32.totalorder %s863_s12, %s921_s4 }
 0x110   : > { %p653_p0 = scmp.lt.u32.totalorder %s651_s28, %s647_s24  ;;  %p655_p2 = scmp.lt.u32.totalorder %s647_s24, %s863_s12 }
 0x111   : > { %p649_p11 = pnand %p648_p10, %p817_p8 }
 0x112   : > { %p654_p1 = por %p653_p0, %p652_p13 }
 0x113   : > { %p650_p12 = pneg %p649_p11 }
 0x114   : > { %p656_p3 = por %p655_p2, %p654_p1 }
 0x116   : > { %p657_p4 = pnand %p656_p3, %p650_p12 }
 0x118   : > { %660 = shalt.err (!%p657_p4)
}
 0x119   : > { %s730_s11 = smov 128   ;;  %s731_s19 = smov 8  }
 0x11a   : > { %560 = dma.vmem_to_hbm [thread:$0]  (%p817_p8), %s858_s6, 256, %s863_s12, %s424_s18, %s730_s11, %s730_s11, %s731_s19  }
 0x11b PF: > { %p566_p5 = scmp.ge.s32.totalorder %s727_s22, 2  ;;  %s454_s13 = sand.u32 1, %s699_s15  }
 0x11c   : > { %s455_s14 = scalar_lea.sflag [#allocation4], %s454_s13 }
 0x11d   : > { %p563_p6 = pnand %p566_p5, %p821_p9 }
 0x11f   : > { %694 = dma.done.wait (!%p563_p6), %s455_s14, 256  }
 0x120   : > { %696 = vsyncadd (!%p563_p6), %s455_s14, 4294967040  ;;  %s17_s22 = sadd.s32 1, %s727_s22   ;;  %s925_s15 = smov %s703_s16 }
 0x121   : > { %p14_p7 = scmp.ge.s32.totalorder %s17_s22, 10   ;;  %s926_s16 = smov %s707_s17 }
 0x122   : > { %s927_s17 = smov %s829_s8  ;;  %s928_s18 = smov %s719_s20 }
 0x123   : > { %s929_s19 = smov %s723_s21  ;;  %s930_s20 = smov %s933_s25 }
 0x124   : > { %s931_s21 = smov %s937_s26  ;;  %16 = sbr.rel (!%p14_p7) target bundleno = 5 (0x5), region = 117 }
 0x12b   :  { %460 = vsyncpa [#allocation4], 1 }
 0x12c   :  { %462 = vsyncpa [#allocation4 + $0x1], 1 }

// kernel: tpu_custom_call.1
= control target key start
LH: loop header
LB: loop body
LE: loop exit
PB: predicated region body
PF: predicated region fallthrough
CT: control target
= control target key end

     0   :  { %9 = vsyncpa [#allocation4], 0  ;;  %s917_s0 = inlined_call_operand.vmem [shape: f32[2,2,2,64,4], index: 0, kind: input, shape index: {}]   ;;  %s918_s1 = inlined_call_operand.vmem [shape: f32[1,4], index: 1, kind: input, shape index: {}]   ;;  %s919_s2 = inlined_call_operand.vmem [shape: f32[1,4], index: 2, kind: input, shape index: {}]   ;;  %s920_s3 = inlined_call_operand.vmem [shape: f32[4,128], index: 3, kind: input, shape index: {}]   ;;  %s921_s4 = inlined_call_operand.hbm [shape: f32[2,64,128], index: 4, kind: output, shape index: {}]  }
   0x1   :  { %11 = vsyncpa [#allocation4 + $0x1], 0  ;;  %s757_s15 = smov 0   ;;  %s759_s16 = smov 0  }
   0x2   :  { %s761_s17 = smov 0   ;;  %s763_s18 = smov 0  }
   0x3   :  { %s765_s19 = smov 0   ;;  %s767_s20 = smov 0  }
   0x4   :  { %s769_s21 = smov 0   ;;  %s771_s22 = smov 0  }
   0x5 LB: > { %s524_s23 = sadd.s32 4294967295, %s727_s22   ;;  %s525_s24 = sadd.s32 4294967294, %s727_s22   ;;  %s727_s22 = sphi %s771_s22, %s17_s22   ;;  %s723_s21 = sphi %s769_s21, %s931_s21   ;;  %s719_s20 = sphi %s767_s20, %s930_s20   ;;  %s715_s19 = sphi %s765_s19, %s929_s19   ;;  %s711_s18 = sphi %s763_s18, %s928_s18   ;;  %s707_s17 = sphi %s761_s17, %s927_s17   ;;  %s703_s16 = sphi %s759_s16, %s926_s16   ;;  %s699_s15 = sphi %s757_s15, %s925_s15  }
   0x6   : > { %s26_s25 = sadd.s32 1, %s719_s20  ;;  %s29_s26 = sadd.s32 1, %s723_s21 }
   0x7   : > { %p27_p0 = scmp.ge.s32.totalorder %s26_s25, 4  ;;  %p45_p1 = scmp.ne.s32.totalorder %s707_s17, %s703_s16 }
   0x8   : > { %p46_p2 = scmp.eq.s32.totalorder %s727_s22, 0  ;;  %p140_p5 = scmp.eq.s32.totalorder %s524_s23, 7 }
   0x9   : > { %s933_s25 = smov (%p27_p0, %s26_s25), 0  ;;  %s935_s26 = smov (!%p27_p0, %s29_s26), %s723_s21 }
   0xa   : > { %s34_s27 = ssub.s32 %s719_s20, %s933_s25  ;;  %p809_p3 = por %p46_p2, %p45_p1 }
   0xb   : > { %p31_p4 = scmp.ge.s32.totalorder %s935_s26, 2  ;;  %p145_p6 = scmp.ne.s32.totalorder %s703_s16, %s699_s15 }
   0xc   : > { %p146_p7 = scmp.eq.s32.totalorder %s525_s24, 7  ;;  %p817_p8 = por %p140_p5, %p45_p1 }
   0xd   : > { %s937_s26 = smov (%p31_p4, %s935_s26), 0  ;;  %s38_s7 = sadd.s32 1, %s707_s17 }
   0xe   : > { %p821_p9 = por %p146_p7, %p145_p6  ;;  %s33_s5 = ssub.s32 %s723_s21, %s937_s26 }
   0xf   : > { %s35_s6 = sor.u32 %s34_s27, %s33_s5  ;;  %p527_p11 = scmp.ge.s32.totalorder %s727_s22, 8 }
  0x10   : > { %p36_p10 = scmp.eq.s32.totalorder %s35_s6, 0 }
  0x11   : > { %171 = sbr.rel (%p527_p11) target bundleno = 35 (0x23), region = 28 }
  0x12   : > { %s829_s8 = scalar_select %p36_p10, %s707_s17, %s38_s7  }
  0x18   : > { %174 = sbr.rel (!%p809_p3) target bundleno = 35 (0x23), region = 32  ;;  %s176_s9 = sand.u32 (%p809_p3), 1, %s707_s17  }
  0x19   : > { %s529_s10 = sshll.u32 (%p809_p3), %s719_s20, 1  ;;  %s528_s11 = sshll.u32 (%p809_p3), %s176_s9, 6 }
  0x1a   : > { %s530_s12 = sshll.u32 (%p809_p3), %s723_s21, 5  ;;  %s178_s5 = scalar_lea.vmem (%p809_p3), [#allocation2], %s528_s11 }
  0x1b   : > { %s181_s13 = sadd.s32 (%p809_p3), %s530_s12, %s529_s10 }
  0x1c   : > { %s531_s14 = sshll.u32 (%p809_p3), %s181_s13, 3 }
  0x1d   : > { %s183_s27 = scalar_lea.vmem (%p809_p3), %s917_s0, %s531_s14 }
  0x1e   : > { %v225_v0 = vld [vmem:[%s183_s27] sm:$0xff] (%p809_p3)  ;;  %v227_v1 = vld [vmem:[%s183_s27 + $0x8] sm:$0xff] (%p809_p3) }
  0x1f   : > { %v229_v2 = vld [vmem:[%s183_s27 + $0x40] sm:$0xff]  ;;  %226 = vst [vmem:[%s178_s5] sm:$0xff] %v225_v0  ;;  %228 = vst [vmem:[%s178_s5 + $0x8] sm:$0xff] %v227_v1  ;;  %v231_v3 = vld [vmem:[%s183_s27 + $0x48] sm:$0xff] }
  0x20   : > { %230 = vst [vmem:[%s178_s5 + $0x10] sm:$0xff] %v229_v2  ;;  %v233_v4 = vld [vmem:[%s183_s27 + $0x80] sm:$0xff]  ;;  %v235_v5 = vld [vmem:[%s183_s27 + $0x88] sm:$0xff]  ;;  %232 = vst [vmem:[%s178_s5 + $0x18] sm:$0xff] %v231_v3 }
  0x21   : > { %234 = vst [vmem:[%s178_s5 + $0x20] sm:$0xff] %v233_v4  ;;  %236 = vst [vmem:[%s178_s5 + $0x28] sm:$0xff] %v235_v5  ;;  %v237_v6 = vld [vmem:[%s183_s27 + $0xc0] sm:$0xff]  ;;  %v239_v7 = vld [vmem:[%s183_s27 + $0xc8] sm:$0xff] }
  0x22   : > { %238 = vst [vmem:[%s178_s5 + $0x30] sm:$0xff] %v237_v6  ;;  %240 = vst [vmem:[%s178_s5 + $0x38] sm:$0xff] %v239_v7 }
  0x23 PF: > { %p532_p12 = scmp.ge.s32.totalorder %s727_s22, 1  ;;  %p245_p13 = scmp.lt.s32.totalorder %s727_s22, 9 }
  0x25   : > { %p246_p0 = pnand %p532_p12, %p245_p13 }
  0x26   : > { %v334_v8 = vld [vmem:[%s920_s3] sm:$0xf] (!%p246_p0)  ;;  %vm342_vm0 = vcmask (!%p246_p0), 1043456   ;;  %s846_s7 = sand.u32 (!%p246_p0), 1, %s703_s16   ;;  %vm335_vm1 = vcmask (!%p246_p0), 31744   ;;  %s547_s24 = sshll.u32 (!%p246_p0), %s711_s18, 1 }
  0x27   : > { %249 = sbr.rel (%p246_p0) target bundleno = 283 (0x11b), region = 70  ;;  %555 = vmatprep.subr.msk.mxu0 (!%p246_p0), %vm342_vm0, %v334_v8  ;;  %s533_s9 = sshll.u32 (!%p246_p0), %s846_s7, 6  ;;  %v535_v9 = vld [vmem:[%s918_s1] ss:$0 sm:$0xff] (!%p246_p0) }
  0x28   : > { %556 = vmatpush3.msk.msra.mxu0 (!%p246_p0), %vm342_vm0, %v334_v8  ;;  %v536_v10 = vld [vmem:[%s919_s2] ss:$0 sm:$0xff] (!%p246_p0)  ;;  %s254_s14 = scalar_lea.vmem (!%p246_p0), [#allocation2], %s533_s9  ;;  %s534_s23 = sshll.u32 (!%p246_p0), %s846_s7, 4 }
  0x29   : > { %v281_v11 = vld [vmem:[%s254_s14] sm:$0xff] (!%p246_p0)  ;;  %v537_v12 = vld [vmem:[%s254_s14 + $0x10] sm:$0xff] (!%p246_p0)  ;;  %v282_v18 = vld [vmem:[%s254_s14 + $0x8] sm:$0xff] (!%p246_p0)  ;;  %s548_s27 = sshll.u32 (!%p246_p0), %s715_s19, 3  ;;  %s276_s28 = scalar_lea.vmem (!%p246_p0), [#allocation3], %s534_s23 }
  0x2a   : > { %v539_v13 = vld [vmem:[%s254_s14 + $0x20] sm:$0xff] (!%p246_p0)  ;;  %v289_v14 = vmul.f32 (!%p246_p0), %v535_v9, %v281_v11  ;;  %v304_v15 = vmul.f32 (!%p246_p0), %v537_v12, %v535_v9  ;;  %v541_v17 = vld [vmem:[%s254_s14 + $0x30] sm:$0xff] (!%p246_p0)  ;;  %v538_v19 = vld [vmem:[%s254_s14 + $0x18] sm:$0xff] (!%p246_p0)  ;;  %v290_v21 = vmul.f32 (!%p246_p0), %v535_v9, %v282_v18  ;;  %s436_s5 = sadd.s32 (!%p246_p0), %s548_s27, %s547_s24  ;;  %s439_s6 = sshll.u32 (!%p246_p0), %s276_s28, 4  ;;  %s858_s6 = int_to_ptr.vmem [resolvable:$true] %s439_s6 }
  0x2b   : > { %v315_v16 = vmul.f32 (!%p246_p0), %v539_v13, %v535_v9  ;;  %v326_v20 = vmul.f32 (!%p246_p0), %v541_v17, %v535_v9  ;;  %v305_v22 = vmul.f32 (!%p246_p0), %v538_v19, %v535_v9  ;;  %v540_v23 = vld [vmem:[%s254_s14 + $0x28] sm:$0xff] (!%p246_p0)  ;;  %v542_v24 = vld [vmem:[%s254_s14 + $0x38] sm:$0xff] (!%p246_p0)  ;;  %s549_s9 = sshll.u32 (!%p246_p0), %s436_s5, 7  ;;  %s424_s18 = scalar_lea.sflag (!%p246_p0), [#allocation4], %s846_s7 }
  0x2c   : > { %v297_v25 = vadd.f32 (!%p246_p0), %v536_v10, %v289_v14  ;;  %v306_v26 = vadd.f32 (!%p246_p0), %v536_v10, %v304_v15  ;;  %v316_v28 = vmul.f32 (!%p246_p0), %v540_v23, %v535_v9  ;;  %v298_v30 = vadd.f32 (!%p246_p0), %v536_v10, %v290_v21  ;;  %s863_s12 = scalar_lea.hbm (!%p246_p0), %s921_s4, %s549_s9  ;;  %s633_s19 = scalar_lea.vmem (!%p246_p0), %s858_s6, 256 }
  0x2d   : > { %v317_v27 = vadd.f32 (!%p246_p0), %v536_v10, %v315_v16  ;;  %v328_v29 = vadd.f32 (!%p246_p0), %v536_v10, %v326_v20  ;;  %v307_v31 = vadd.f32 (!%p246_p0), %v536_v10, %v305_v22  ;;  %v327_v32 = vmul.f32 (!%p246_p0), %v542_v24, %v535_v9  ;;  %p634_p1 = scmp.ne.s32.totalorder (!%p246_p0), %s858_s6, %s633_s19  ;;  %s729_s13 = smov (!%p246_p0), [#allocation3]  }
  0x2e   : > { %v299_v33 = vmax.f32 %v297_v25, 0.0  ;;  %v308_v34 = vmax.f32 %v306_v26, 0.0  ;;  %v318_v36 = vadd.f32 %v536_v10, %v316_v28  ;;  %v300_v37 = vmax.f32 %v298_v30, 0.0  ;;  %s637_s14 = sshll.u32 %s729_s13, 4  ;;  %s638_s14 = int_to_ptr.vmem [resolvable:$false] %s637_s14 }
  0x2f   : > { %v319_v35 = vmax.f32 %v317_v27, 0.0  ;;  %v309_v38 = vmax.f32 %v307_v31, 0.0  ;;  %v329_v39 = vadd.f32 %v536_v10, %v327_v32  ;;  %v330_v41 = vmax.f32 %v328_v29, 0.0  ;;  %p635_p2 = pnand %p634_p1, %p817_p8  ;;  %s639_s23 = scalar_lea.vmem %s638_s14, 512 }
  0x30   : > { %v310_v40 = vadd.f32 %v308_v34, %v299_v33  ;;  %v320_v42 = vmax.f32 %v318_v36, 0.0  ;;  %p640_p4 = scmp.lt.s32.totalorder %s858_s6, %s638_s14  ;;  %p641_p5 = scmp.lt.s32.totalorder %s639_s23, %s633_s19 }
  0x31   : > { %v311_v43 = vadd.f32 %v309_v38, %v300_v37  ;;  %v331_v44 = vmax.f32 %v329_v39, 0.0  ;;  %p636_p3 = pneg %p635_p2 }
  0x32   : > { %v321_v45 = vadd.f32 %v319_v35, %v310_v40  ;;  %p642_p6 = por %p641_p5, %p640_p4 }
  0x33   : > { %v322_v46 = vadd.f32 %v320_v42, %v311_v43 }
  0x34   : > { %v332_v47 = vadd.f32 %v330_v41, %v321_v45  ;;  %p643_p7 = pnand %p642_p6, %p636_p3 }
  0x35   : > { %v333_v48 = vadd.f32 %v331_v44, %v322_v46 }
  0x36   : > { %557 = vmatprep.mubr.msk.f32.mxu0 %vm335_vm1, %v332_v47 }
  0x37   : > { %558 = vmatmul.mubr.msk.f32.vlgmr.msra.gmra.mrb[0].mxu0 %vm335_vm1, %v333_v48 }
 0x10a   : > { %v559_v49 = vpop.f32.mrb[0].mxu0 }
 0x10b   : > { %422 = vst [vmem:[%s276_s28 + $0x8] sm:$0xff] %v559_v49  ;;  %v412_v50 = vpop.f32.mrb[1].mxu0 }
 0x10c   : > { %421 = vst [vmem:[%s276_s28] sm:$0xff] %v412_v50 }
 0x10d   : > { %646 = shalt.err (!%p643_p7)
}
 0x10e   : > { %s647_s24 = scalar_lea.hbm %s863_s12, 256  ;;  %s651_s28 = scalar_lea.hbm %s921_s4, 2048 }
 0x10f   : > { %p648_p10 = scmp.ne.s32.totalorder %s863_s12, %s647_s24  ;;  %p652_p13 = scmp.lt.u32.totalorder %s863_s12, %s921_s4 }
 0x110   : > { %p653_p0 = scmp.lt.u32.totalorder %s651_s28, %s647_s24  ;;  %p655_p2 = scmp.lt.u32.totalorder %s647_s24, %s863_s12 }
 0x111   : > { %p649_p11 = pnand %p648_p10, %p817_p8 }
 0x112   : > { %p654_p1 = por %p653_p0, %p652_p13 }
 0x113   : > { %p650_p12 = pneg %p649_p11 }
 0x114   : > { %p656_p3 = por %p655_p2, %p654_p1 }
 0x116   : > { %p657_p4 = pnand %p656_p3, %p650_p12 }
 0x118   : > { %660 = shalt.err (!%p657_p4)
}
 0x119   : > { %s730_s11 = smov 128   ;;  %s731_s19 = smov 8  }
 0x11a   : > { %560 = dma.vmem_to_hbm [thread:$0]  (%p817_p8), %s858_s6, 256, %s863_s12, %s424_s18, %s730_s11, %s730_s11, %s731_s19  }
 0x11b PF: > { %p566_p5 = scmp.ge.s32.totalorder %s727_s22, 2  ;;  %s454_s13 = sand.u32 1, %s699_s15  }
 0x11c   : > { %s455_s14 = scalar_lea.sflag [#allocation4], %s454_s13 }
 0x11d   : > { %p563_p6 = pnand %p566_p5, %p821_p9 }
 0x11f   : > { %694 = dma.done.wait (!%p563_p6), %s455_s14, 256  }
 0x120   : > { %696 = vsyncadd (!%p563_p6), %s455_s14, 4294967040  ;;  %s17_s22 = sadd.s32 1, %s727_s22   ;;  %s925_s15 = smov %s703_s16 }
 0x121   : > { %p14_p7 = scmp.ge.s32.totalorder %s17_s22, 10   ;;  %s926_s16 = smov %s707_s17 }
 0x122   : > { %s927_s17 = smov %s829_s8  ;;  %s928_s18 = smov %s719_s20 }
 0x123   : > { %s929_s19 = smov %s723_s21  ;;  %s930_s20 = smov %s933_s25 }
 0x124   : > { %s931_s21 = smov %s937_s26  ;;  %16 = sbr.rel (!%p14_p7) target bundleno = 5 (0x5), region = 117 }
 0x12b   :  { %460 = vsyncpa [#allocation4], 1 }
 0x12c   :  { %462 = vsyncpa [#allocation4 + $0x1], 1 }

</bundles_post_ra>
